<compile_context>
chip_gen: v7x
topology: tpu7x:2x2x1
jax: 0.10.0
libtpu: 0.0.40
codegen_flags: <defaults>
</compile_context>

<pallas_src>
import jax
import jax.numpy as jnp
from jax.experimental import pallas as pl
from jax.experimental.pallas import tpu as pltpu


def _mask_attention_kernel(x_ref, mask_ref, w_ref, b_ref, ctx_ref, attn_ref):
    # x_ref   : (TB, S, D)  batch tile of inputs (VMEM)
    # mask_ref: (TB, S)     float32, 0 => masked out (VMEM)
    # w_ref   : (1, D)      nn.Linear(D, 1) weight, resident across grid (VMEM)
    # b_ref   : (1,)        bias (SMEM scalar)
    # ctx_ref : (TB, D)     output context
    # attn_ref: (TB, S)     output attention weights
    x = x_ref[...]                                        # (TB, S, D)
    xf = x.astype(jnp.float32)                            # f32 working copy
    w = w_ref[...].astype(jnp.float32)                    # (1, D)
    b = b_ref[0]                                          # scalar from SMEM

    # scores = sum_d x * w + b   (VPU mul + XLU lane reduce; no MXU matvec)
    scores = jnp.sum(xf * w[None, :, :], axis=-1) + b     # (TB, S)

    # masked_fill(mask == 0, -1e9)
    scores = jnp.where(mask_ref[...] == 0.0, jnp.float32(-1e9), scores)

    # numerically stable softmax over the sequence axis
    m = jnp.max(scores, axis=-1, keepdims=True)           # (TB, 1)
    e = jnp.exp(scores - m)                               # (TB, S)
    denom = jnp.sum(e, axis=-1, keepdims=True)            # (TB, 1)
    r = pl.reciprocal(denom, approx=True)                 # EUP vrcp (free slot)
    r = r * (2.0 - denom * r)                             # Newton step -> ~f32
    p = e * r                                             # (TB, S)

    attn_ref[...] = p.astype(attn_ref.dtype)

    # context = sum_s p[b, s] * x[b, s, :]  (VPU broadcast-mul + sublane
    # reduce; avoids restaging the (S, D) tile into the MXU per batch row)
    ctx = jnp.sum(p[:, :, None] * xf, axis=1)             # (TB, D) f32
    ctx_ref[...] = ctx.astype(ctx_ref.dtype)


def _vmem_limit_bytes():
    """Per-chip scoped-VMEM limit: ~5/8 of physical, capped at 64 MiB.
    -> 40 MiB on v7x (64-MiB parts), 64 MiB on v5e/v6e (128-MiB parts)."""
    try:
        cap = int(pltpu.get_tpu_info().vmem_capacity_bytes)
    except Exception:
        cap = 64 * 1024 * 1024        # conservative fallback
    return min((cap * 5) // 8, 64 * 1024 * 1024)


def _choose_block_b(B, S, D, itemsize, working_budget, min_steps=8):
    """Batch tile so the double-buffered input block PLUS the in-kernel f32
    temporaries fit `working_budget`, while keeping >= min_steps grid steps
    (pipelining + v7x dual-TC sharding) whenever B allows it."""
    # Per batch row in the block:
    #   2 * S*D*itemsize : double-buffered input block
    #   2 * S*D*4        : f32 temporaries (x*w product, p*x product)
    #   small            : mask/attn (S) and ctx (D) buffers
    per_row = S * D * (2 * itemsize + 8) + 4 * S * (itemsize + 4) + 2 * D * itemsize
    tb_cap = max(1, int(working_budget) // per_row)
    if B <= 8:
        # Tiny batch: one block (tb == B keeps the (tb, S)/(tb, D) tiles legal;
        # tb < 8 and != B would violate the sublane constraint).
        return B
    tb = min(tb_cap, max(1, pl.cdiv(B, min_steps)))
    tb = max(8, (tb // 8) * 8)        # sublane-dense (tb, S)/(tb, D) tiles
    # TODO(synk): if S*D is so large that tb=8 still overflows the budget, an
    # S-chunked online-softmax variant would be needed to shrink the tile.
    return min(tb, B)


def mask_attention(inputs, weight, bias, mask=None, block_b=None):
    """Pallas equivalent of MaskAttention.forward.

    inputs: (B, S, D)
    weight: (1, D)    nn.Linear(input_size, 1).weight
    bias:   (1,)      nn.Linear(input_size, 1).bias
    mask:   (B, S) or None (0 => masked out; any dtype)

    Returns (context (B, D), attn_weights (B, 1, S)).
    """
    B, S, D = inputs.shape
    itemsize = jnp.dtype(inputs.dtype).itemsize

    vmem_limit = _vmem_limit_bytes()
    working_budget = vmem_limit - 8 * 1024 * 1024     # Mosaic scratch headroom
    tb = block_b if block_b is not None else _choose_block_b(
        B, S, D, itemsize, working_budget)
    tb = max(1, min(tb, B))
    grid_b = pl.cdiv(B, tb)
    b_blocks = grid_b * tb

    # Only the cheap (B, S) mask is padded when the grid is ragged; the
    # (B, S, D) inputs and both outputs are left un-padded (Pallas clips the
    # final block: garbage input rows are computed but their outputs are
    # dropped, and rows are independent so nothing contaminates valid rows).
    if mask is None:
        mask_f = jnp.ones((b_blocks, S), dtype=jnp.float32)
    else:
        mask_f = jnp.where(mask == 0, 0.0, 1.0).astype(jnp.float32)
        if b_blocks != B:
            mask_f = jnp.pad(mask_f, ((0, b_blocks - B), (0, 0)))

    w = weight.reshape(1, D)
    b1 = bias.reshape(1).astype(jnp.float32)

    ctx, attn = pl.pallas_call(
        _mask_attention_kernel,
        out_shape=(
            jax.ShapeDtypeStruct((B, D), inputs.dtype),
            jax.ShapeDtypeStruct((B, S), inputs.dtype),
        ),
        grid_spec=pltpu.PrefetchScalarGridSpec(
            num_scalar_prefetch=0,
            grid=(grid_b,),
            in_specs=[
                pl.BlockSpec((tb, S, D), lambda i: (i, 0, 0)),      # inputs
                pl.BlockSpec((tb, S), lambda i: (i, 0)),            # mask
                pl.BlockSpec((1, D), lambda i: (0, 0)),             # weight (VMEM resident)
                pl.BlockSpec(memory_space=pltpu.MemorySpace.SMEM),  # bias scalar
            ],
            out_specs=[
                pl.BlockSpec((tb, D), lambda i: (i, 0)),            # context
                pl.BlockSpec((tb, S), lambda i: (i, 0)),            # attn weights
            ],
        ),
        compiler_params=pltpu.CompilerParams(
            dimension_semantics=("parallel",),
            vmem_limit_bytes=vmem_limit,
        ),
    )(inputs, mask_f, w, b1)

    return ctx, attn.reshape(B, 1, S)


def _reference(inputs, weight, bias, mask=None):
    # Pure-JAX reference matching the PyTorch forward exactly.
    scores = jnp.einsum("bsd,od->bso", inputs, weight)[..., 0] + bias[0]  # (B, S)
    if mask is not None:
        scores = jnp.where(mask == 0, -1000000000.0, scores)
    attn = jax.nn.softmax(scores, axis=-1)[:, None, :]                    # (B, 1, S)
    ctx = jnp.einsum("bos,bsd->bod", attn, inputs)[:, 0, :]               # (B, D)
    return ctx, attn


if __name__ == "__main__":
    key = jax.random.PRNGKey(0)
    k_x, k_m, k_w, k_b, k_x2, k_m2 = jax.random.split(key, 6)

    B, S, D = 2, 8, 32
    inputs = jax.random.normal(k_x, (B, S, D), dtype=jnp.float32)
    mask = (jax.random.uniform(k_m, (B, S)) > 0.3).astype(jnp.float32)
    mask = mask.at[:, 0].set(1.0)   # at least one unmasked position per row

    # Deterministic nn.Linear(D, 1)-style init: uniform(-1/sqrt(D), 1/sqrt(D)).
    bound = 1.0 / (D ** 0.5)
    weight = jax.random.uniform(k_w, (1, D), minval=-bound, maxval=bound,
                                dtype=jnp.float32)
    bias = jax.random.uniform(k_b, (1,), minval=-bound, maxval=bound,
                              dtype=jnp.float32)

    # 1) Small problem: single block covering the whole (tiny) batch, with mask.
    ctx, attn = mask_attention(inputs, weight, bias, mask)
    jax.block_until_ready((ctx, attn))
    ctx_ref, attn_ref = _reference(inputs, weight, bias, mask)
    assert ctx.shape == (B, D) and attn.shape == (B, 1, S)
    assert jnp.allclose(ctx, ctx_ref, atol=1e-4, rtol=1e-4)
    assert jnp.allclose(attn, attn_ref, atol=1e-4, rtol=1e-4)

    # 2) mask=None path.
    ctx_n, attn_n = mask_attention(inputs, weight, bias, None)
    jax.block_until_ready((ctx_n, attn_n))
    ctx_nr, attn_nr = _reference(inputs, weight, bias, None)
    assert jnp.allclose(ctx_n, ctx_nr, atol=1e-4, rtol=1e-4)
    assert jnp.allclose(attn_n, attn_nr, atol=1e-4, rtol=1e-4)

    # 3) Multi-step grid with a ragged final batch block (B=20, TB=8 -> 3 steps,
    #    inputs NOT padded; only the mask is padded).
    B2 = 20
    inputs2 = jax.random.normal(k_x2, (B2, S, D), dtype=jnp.float32)
    mask2 = (jax.random.uniform(k_m2, (B2, S)) > 0.3).astype(jnp.float32)
    mask2 = mask2.at[:, 0].set(1.0)
    ctx2, attn2 = mask_attention(inputs2, weight, bias, mask2, block_b=8)
    jax.block_until_ready((ctx2, attn2))
    ctx2_ref, attn2_ref = _reference(inputs2, weight, bias, mask2)
    assert ctx2.shape == (B2, D) and attn2.shape == (B2, 1, S)
    assert jnp.allclose(ctx2, ctx2_ref, atol=1e-4, rtol=1e-4)
    assert jnp.allclose(attn2, attn2_ref, atol=1e-4, rtol=1e-4)

    print("KERNEL_OK")
</pallas_src>

<mosaic_0001>
module attributes {stable_mosaic.version = 11 : i64} {
  func.func @_mask_attention_kernel(%arg0: i32, %arg1: memref<2x8x32xf32, #tpu.memory_space<vmem>>, %arg2: memref<2x8xf32, #tpu.memory_space<vmem>>, %arg3: memref<1x32xf32, #tpu.memory_space<vmem>>, %arg4: memref<1xf32, #tpu.memory_space<smem>>, %arg5: memref<2x32xf32, #tpu.memory_space<vmem>>, %arg6: memref<2x8xf32, #tpu.memory_space<vmem>>) attributes {dimension_semantics = [#tpu.dimension_semantics<parallel>], iteration_bounds = array<i64: 1>, scalar_prefetch = 0 : i64, scratch_operands = 0 : i64, tpu.core_type = #tpu.core_type<tc>, window_params = [{transform_indices = @transform_0, window_bounds = array<i64: 2, 8, 32>}, {transform_indices = @transform_1, window_bounds = array<i64: 2, 8>}, {pipeline_mode = #tpu.pipeline_mode<synchronous>, transform_indices = @transform_2, window_bounds = array<i64: 1, 32>}, {transform_indices = @transform_3, window_bounds = array<i64: 1>}, {transform_indices = @transform_4, window_bounds = array<i64: 2, 32>}, {transform_indices = @transform_5, window_bounds = array<i64: 2, 8>}]} {
    %c0 = arith.constant 0 : index
    %c0_0 = arith.constant 0 : index
    %c0_1 = arith.constant 0 : index
    %0 = vector.load %arg1[%c0, %c0_0, %c0_1] : memref<2x8x32xf32, #tpu.memory_space<vmem>>, vector<2x8x32xf32>
    %c0_2 = arith.constant 0 : index
    %c0_3 = arith.constant 0 : index
    %1 = vector.load %arg3[%c0_2, %c0_3] : memref<1x32xf32, #tpu.memory_space<vmem>>, vector<1x32xf32>
    %c0_4 = arith.constant 0 : index
    %2 = memref.load %arg4[%c0_4] : memref<1xf32, #tpu.memory_space<smem>>
    %3 = vector.shape_cast %1 : vector<1x32xf32> to vector<1x1x32xf32>
    %4 = vector.broadcast %3 : vector<1x1x32xf32> to vector<2x8x32xf32>
    %5 = arith.mulf %0, %4 : vector<2x8x32xf32>
    %cst = arith.constant dense<0.000000e+00> : vector<2x8xf32>
    %6 = vector.multi_reduction <add>, %5, %cst [2] : vector<2x8x32xf32> to vector<2x8xf32>
    %7 = vector.broadcast %2 : f32 to vector<2x8xf32>
    %8 = arith.addf %6, %7 : vector<2x8xf32>
    %c0_5 = arith.constant 0 : index
    %c0_6 = arith.constant 0 : index
    %9 = vector.load %arg2[%c0_5, %c0_6] : memref<2x8xf32, #tpu.memory_space<vmem>>, vector<2x8xf32>
    %cst_7 = arith.constant 0.000000e+00 : f32
    %10 = vector.broadcast %cst_7 : f32 to vector<2x8xf32>
    %11 = arith.cmpf oeq, %9, %10 : vector<2x8xf32>
    %cst_8 = arith.constant -1.000000e+09 : f32
    %12 = vector.broadcast %cst_8 : f32 to vector<2x8xf32>
    %13 = arith.select %11, %12, %8 : vector<2x8xi1>, vector<2x8xf32>
    %cst_9 = arith.constant dense<0xFF800000> : vector<2xf32>
    %14 = vector.multi_reduction <maximumf>, %13, %cst_9 [1] : vector<2x8xf32> to vector<2xf32>
    %15 = vector.shape_cast %14 : vector<2xf32> to vector<2x1xf32>
    %16 = vector.broadcast %15 : vector<2x1xf32> to vector<2x8xf32>
    %17 = arith.subf %13, %16 : vector<2x8xf32>
    %18 = math.exp %17 : vector<2x8xf32>
    %cst_10 = arith.constant dense<0.000000e+00> : vector<2xf32>
    %19 = vector.multi_reduction <add>, %18, %cst_10 [1] : vector<2x8xf32> to vector<2xf32>
    %20 = vector.shape_cast %19 : vector<2xf32> to vector<2x1xf32>
    %21 = tpu.reciprocal %20 {approx = true} : vector<2x1xf32> -> vector<2x1xf32>
    %22 = arith.mulf %20, %21 : vector<2x1xf32>
    %cst_11 = arith.constant 2.000000e+00 : f32
    %23 = vector.broadcast %cst_11 : f32 to vector<2x1xf32>
    %24 = arith.subf %23, %22 : vector<2x1xf32>
    %25 = arith.mulf %21, %24 : vector<2x1xf32>
    %26 = vector.broadcast %25 : vector<2x1xf32> to vector<2x8xf32>
    %27 = arith.mulf %18, %26 : vector<2x8xf32>
    %c0_12 = arith.constant 0 : index
    %c0_13 = arith.constant 0 : index
    %28 = vector.load %arg6[%c0_12, %c0_13] : memref<2x8xf32, #tpu.memory_space<vmem>>, vector<2x8xf32>
    tpu.vector_store %arg6[%c0_12, %c0_13], %27 {strides = array<i32>} : memref<2x8xf32, #tpu.memory_space<vmem>>, vector<2x8xf32>,
    %29 = vector.shape_cast %27 : vector<2x8xf32> to vector<2x8x1xf32>
    %30 = vector.broadcast %29 : vector<2x8x1xf32> to vector<2x8x32xf32>
    %31 = arith.mulf %30, %0 : vector<2x8x32xf32>
    %cst_14 = arith.constant dense<0.000000e+00> : vector<2x32xf32>
    %32 = vector.multi_reduction <add>, %31, %cst_14 [1] : vector<2x8x32xf32> to vector<2x32xf32>
    %c0_15 = arith.constant 0 : index
    %c0_16 = arith.constant 0 : index
    %33 = vector.load %arg5[%c0_15, %c0_16] : memref<2x32xf32, #tpu.memory_space<vmem>>, vector<2x32xf32>
    tpu.vector_store %arg5[%c0_15, %c0_16], %32 {strides = array<i32>} : memref<2x32xf32, #tpu.memory_space<vmem>>, vector<2x32xf32>,
    return
  }
  func.func @transform_0(%arg0: i32) -> (i32, i32, i32) {
    %c0_i32 = arith.constant 0 : i32
    %c0_i32_0 = arith.constant 0 : i32
    %c0_i32_1 = arith.constant 0 : i32
    return %arg0, %c0_i32, %c0_i32_0 : i32, i32, i32
  }
  func.func @transform_1(%arg0: i32) -> (i32, i32) {
    %c0_i32 = arith.constant 0 : i32
    %c0_i32_0 = arith.constant 0 : i32
    return %arg0, %c0_i32 : i32, i32
  }
  func.func @transform_2(%arg0: i32) -> (i32, i32) {
    %c0_i32 = arith.constant 0 : i32
    %c0_i32_0 = arith.constant 0 : i32
    %c0_i32_1 = arith.constant 0 : i32
    return %c0_i32, %c0_i32_0 : i32, i32
  }
  func.func @transform_3(%arg0: i32) -> i32 {
    %c0_i32 = arith.constant 0 : i32
    %c0_i32_0 = arith.constant 0 : i32
    return %c0_i32 : i32
  }
  func.func @transform_4(%arg0: i32) -> (i32, i32) {
    %c0_i32 = arith.constant 0 : i32
    %c0_i32_0 = arith.constant 0 : i32
    return %arg0, %c0_i32 : i32, i32
  }
  func.func @transform_5(%arg0: i32) -> (i32, i32) {
    %c0_i32 = arith.constant 0 : i32
    %c0_i32_0 = arith.constant 0 : i32
    return %arg0, %c0_i32 : i32, i32
  }
}

</mosaic_0001>

<bundles_post_ra>
// kernel: tpu_custom_call.1
= control target key start
LH: loop header
LB: loop body
LE: loop exit
PB: predicated region body
PF: predicated region fallthrough
CT: control target
= control target key end

     0   :  { %12 = vsyncpa [#allocation4], 0  ;;  %s336_s0 = inlined_call_operand.hbm [shape: f32[2,8,32], index: 0, kind: input, shape index: {}]   ;;  %s337_s1 = inlined_call_operand.vmem [shape: f32[2,8], index: 1, kind: input, shape index: {}]   ;;  %s338_s2 = inlined_call_operand.vmem [shape: f32[1,32], index: 2, kind: input, shape index: {}]   ;;  %s339_s3 = inlined_call_operand.<no memory space> [shape: f32[1], index: 3, kind: input, shape index: {}]   ;;  %s340_s4 = inlined_call_operand.hbm [shape: f32[2,32], index: 4, kind: output, shape index: {0}]   ;;  %s341_s5 = inlined_call_operand.hbm [shape: f32[2,8], index: 5, kind: output, shape index: {1}]  }
   0x1   :  { %13 = vsyncpa [#allocation5], 0 }
   0x2   :  { %14 = vsyncpa [#allocation8], 0  ;;  %s239_s18 = smov [#allocation3]   ;;  %s167_s22 = scalar_lea.hbm %s336_s0, 256 }
   0x3   :  { %s20_s19 = sshll.u32 %s239_s18, 4  ;;  %p168_p0 = scmp.ne.s32.totalorder %s336_s0, %s167_s22  ;;  %s21_s19 = int_to_ptr.vmem [resolvable:$true] %s20_s19 }
   0x4   :  { %p171_p1 = scmp.lt.u32.totalorder %s167_s22, %s336_s0 }
   0x6   :  { %p173_p2 = pnand %p171_p1, %p168_p0 }
   0x8   :  { %176 = shalt.err (!%p173_p2)
}
   0x9   :  { %s177_s27 = scalar_lea.vmem %s21_s19, 256  ;;  %p182_p4 = scmp.lt.s32.totalorder %s21_s19, %s21_s19 }
   0xa   :  { %p178_p3 = scmp.ne.s32.totalorder %s21_s19, %s177_s27  ;;  %p183_p5 = scmp.lt.s32.totalorder %s177_s27, %s177_s27 }
   0xc   :  { %p184_p6 = por %p183_p5, %p182_p4 }
   0xe   :  { %p185_p7 = pnand %p184_p6, %p178_p3 }
  0x10   :  { %188 = shalt.err (!%p185_p7)
}
  0x11   :  { %s240_s28 = smov 128   ;;  %s241_s29 = smov 8  }
  0x12   :  { %26 = dma.hbm_to_vmem [thread:$0]  %s336_s0, 256, %s21_s19, [#allocation4], %s240_s28, %s240_s28, %s241_s29  }
  0x13   :  { %233 = dma.done.wait [#allocation4], 256  }
  0x14   :  { %234 = vsyncadd [#allocation4], 4294967040  ;;  %v286_v0 = vld [vmem:[#allocation3] sm:$0xff]  ;;  %vm48_vm0 = vcmask 261120   ;;  %v291_v2 = vld [vmem:[#allocation3 + $0x8] sm:$0xff]  ;;  %v62_v7 = vlaneseq  ;;  %v55_v10 = vstv %s339_s3  ;;  %vm72_vm1 = vcmask 1041409  }
  0x15   :  { %v157_v1 = vld [vmem:[%s338_s2] ss:$0 sm:$0xff]  ;;  %vm76_vm3 = vcmask 58368  }
  0x16   :  { %v46_v3 = vmul.f32 %v157_v1, %v286_v0  ;;  %v47_v4 = vmul.f32 %v157_v1, %v291_v2  ;;  %v63_v8 = vand.u32 127, %v62_v7  ;;  %v65_v9 = vshrl.u32 %v62_v7, 7  ;;  %v58_v15 = vld [vmem:[%s337_s1] sm:$0x3]  ;;  %s242_s1 = smov [#allocation7]  }
  0x17   :  { %vm59_vm2 = vcmp.eq.f32.partialorder %v58_v15, 0.0  ;;  %s144_s3 = sshll.u32 %s242_s1, 4  ;;  %s145_s3 = int_to_ptr.vmem [resolvable:$true] %s144_s3 }
  0x18   :  { %v49_v5 = vsel %vm48_vm0, %v46_v3, 0.0  ;;  %v52_v6 = vsel %vm48_vm0, %v47_v4, 0.0  ;;  %v66_v12 = vsub.s32 %v63_v8, %v65_v9  ;;  %v101_v32 = vsub.s32 1, %v65_v9  ;;  %s189_s11 = scalar_lea.vmem %s145_s3, 32  ;;  %p194_p9 = scmp.lt.s32.totalorder %s145_s3, %s145_s3 }
  0x19   :  { %50 = vadd.xlane.f32.xlu0 %v49_v5  ;;  %v94_v33 = vsub.s32 0, %v65_v9  ;;  %p190_p8 = scmp.ne.s32.totalorder %s145_s3, %s189_s11  ;;  %p195_p10 = scmp.lt.s32.totalorder %s189_s11, %s189_s11 }
  0x1b   :  { %p196_p11 = por %p195_p10, %p194_p9 }
  0x1d   :  { %53 = vadd.xlane.f32.xlu0 %v52_v6  ;;  %p197_p12 = pnand %p196_p11, %p190_p8 }
  0xa6   :  { %v51_v11 = vpop.xlane.xlu0 %50 }
  0xa7   :  { %v56_v13 = vadd.f32 %v55_v10, %v51_v11 }
  0xa9   :  { %v67_v17 = vrot.slane %v56_v13, %v66_v12 }
  0xaa   :  { %v54_v14 = vpop.xlane.xlu0 %53 }
  0xab   :  { %v57_v16 = vadd.f32 %v55_v10, %v54_v14 }
  0xad   :  { %v71_v18 = vrot.slane %v57_v16, %v66_v12 }
  0xaf   :  { %v73_v19 = vsel %vm72_vm1, %v71_v18, %v67_v17 }
  0xb0   :  { %v75_v20 = vsel %vm59_vm2, -1e+09, %v73_v19 }
  0xb1   :  { %v77_v21 = vsel %vm76_vm3, %v75_v20, -inf }
  0xb2   :  { %78 = vmax.xlane.f32.xlu1 %v77_v21 }
 0x13f   :  { %v79_v22 = vpop.xlane.xlu1 %78 }
 0x140   :  { %v80_v23 = vsub.f32 %v75_v20, %v79_v22 }
 0x142   :  { %v81_v24 = vmul.f32 1.442695, %v80_v23 }
 0x144   :  { %163 = vpow2.f32 %v81_v24 }
 0x14e   :  { %v164_v25 = vpop.eup %163 }
 0x14f   :  { %v83_v26 = vsel %vm76_vm3, %v164_v25, 0.0 }
 0x150   :  { %84 = vadd.xlane.f32.xlu1 %v83_v26 }
 0x1dd   :  { %v85_v27 = vpop.xlane.xlu1 %84 }
 0x1de   :  { %165 = vrcp.f32 %v85_v27 }
 0x1e8   :  { %v166_v28 = vpop.eup %165 }
 0x1e9   :  { %v87_v29 = vmul.f32 %v166_v28, %v85_v27 }
 0x1eb   :  { %v88_v30 = vsub.f32 2.0, %v87_v29 }
 0x1ed   :  { %v89_v31 = vmul.f32 %v166_v28, %v88_v30 }
 0x1ef   :  { %v90_v34 = vmul.f32 %v164_v25, %v89_v31 }
 0x1f1   :  { %v102_v35 = vrot.slane %v90_v34, %v101_v32  ;;  %91 = vst.msk [vmem:[#allocation7] sm:$0x3] %vm76_vm3, %v90_v34  ;;  %v95_v36 = vrot.slane %v90_v34, %v94_v33 }
 0x1f3   :  { %104 = vbcast.lane.b32.xlu1 %v102_v35, 256  ;;  %97 = vbcast.lane.b32.xlu0 %v95_v36, 256 }
 0x1f4   :  { %200 = shalt.err (!%p197_p12)
}
 0x1f5   :  { %s201_s14 = scalar_lea.hbm %s341_s5, 32 }
 0x1f6   :  { %p202_p13 = scmp.ne.s32.totalorder %s341_s5, %s201_s14  ;;  %p205_p0 = scmp.lt.u32.totalorder %s201_s14, %s341_s5 }
 0x1f8   :  { %p207_p1 = pnand %p205_p0, %p202_p13 }
 0x1fa   :  { %210 = shalt.err (!%p207_p1)
}
 0x1fb   :  { %147 = dma.vmem_to_hbm [thread:$0]  %s145_s3, 32, %s341_s5, [#allocation8]   ;;  %vm126_vm4 = vcmask 254976  }
 0x1fc   :  { %s243_s5 = smov [#allocation6]  }
 0x1fd   :  { %s134_s21 = sshll.u32 %s243_s5, 4  ;;  %s135_s21 = int_to_ptr.vmem [resolvable:$true] %s134_s21 }
 0x1fe   :  { %s211_s22 = scalar_lea.vmem %s135_s21, 32  ;;  %p216_p3 = scmp.lt.s32.totalorder %s135_s21, %s135_s21 }
 0x1ff   :  { %p212_p2 = scmp.ne.s32.totalorder %s135_s21, %s211_s22  ;;  %p217_p4 = scmp.lt.s32.totalorder %s211_s22, %s211_s22 }
 0x201   :  { %p218_p5 = por %p217_p4, %p216_p3 }
 0x203   :  { %p219_p6 = pnand %p218_p5, %p212_p2 }
 0x265   :  { %v105_v37 = vpop.permute.xlu1 %104  ;;  %v98_v38 = vpop.permute.xlu0 %97 }
 0x266   :  { %v107_v39 = vmul.f32 %v105_v37, %v291_v2  ;;  %v106_v40 = vmul.f32 %v98_v38, %v286_v0 }
 0x268   :  { %v115_v41 = vsel %vm48_vm0, %v107_v39, 0.0  ;;  %v108_v42 = vsel %vm48_vm0, %v106_v40, 0.0 }
 0x269   :  { %v116_v43 = vrot.slane %v115_v41, 4  ;;  %v109_v44 = vrot.slane %v108_v42, 4 }
 0x26b   :  { %v117_v45 = vadd.f32 %v116_v43, %v115_v41  ;;  %v110_v46 = vadd.f32 %v109_v44, %v108_v42 }
 0x26d   :  { %v118_v47 = vrot.slane %v117_v45, 2  ;;  %v111_v48 = vrot.slane %v110_v46, 2 }
 0x26f   :  { %v119_v49 = vadd.f32 %v118_v47, %v117_v45  ;;  %v112_v50 = vadd.f32 %v111_v48, %v110_v46 }
 0x271   :  { %v120_v51 = vrot.slane %v119_v49, 1  ;;  %v113_v52 = vrot.slane %v112_v50, 1 }
 0x273   :  { %v121_v53 = vadd.f32 %v120_v51, %v119_v49  ;;  %v114_v54 = vadd.f32 %v113_v52, %v112_v50 }
 0x275   :  { %v124_v55 = vsel %vm72_vm1, %v121_v53, %v114_v54 }
 0x276   :  { %127 = vst.msk [vmem:[#allocation6] sm:$0x3] %vm126_vm4, %v124_v55 }
 0x277   :  { %222 = shalt.err (!%p219_p6)
}
 0x278   :  { %s223_s25 = scalar_lea.hbm %s340_s4, 32 }
 0x279   :  { %p224_p7 = scmp.ne.s32.totalorder %s340_s4, %s223_s25  ;;  %p227_p8 = scmp.lt.u32.totalorder %s223_s25, %s340_s4 }
 0x27b   :  { %p229_p9 = pnand %p227_p8, %p224_p7 }
 0x27d   :  { %232 = shalt.err (!%p229_p9)
}
 0x27e   :  { %137 = dma.vmem_to_hbm [thread:$0]  %s135_s21, 32, %s340_s4, [#allocation5]  }
 0x27f   :  { %235 = dma.done.wait [#allocation5], 32  }
 0x280   :  { %236 = vsyncadd [#allocation5], 4294967264 }
 0x281   :  { %237 = dma.done.wait [#allocation8], 32  }
 0x282   :  { %238 = vsyncadd [#allocation8], 4294967264 }
 0x283   :  { %154 = vsyncpa [#allocation4], 1 }
 0x284   :  { %155 = vsyncpa [#allocation5], 1 }
 0x285   :  { %156 = vsyncpa [#allocation8], 1 }

</bundles_post_ra>
